<compile_context>
chip_gen: v7x
topology: tpu7x:2x2x1
jax: 0.10.0
libtpu: 0.0.40
codegen_flags: <defaults>
</compile_context>

<pallas_src>
import jax
import jax.numpy as jnp
import numpy as np
from jax.experimental import pallas as pl
from jax.experimental.pallas import tpu as pltpu

EPS = 1e-5
D_PAD = 128   # padded feature width (native lane count)


def spatial_layer_kernel(x_ref, w1e_ref, b1_ref, w2_ref, b2_ref,
                         pn_ref, gamma_ref, beta_ref, exp_ref, o_ref):
    # x_ref:      (B, DP)       input = PyTorch (B, T, C, F) flattened, DP = T*C*F
    # w1e_ref:    (DP, Dpad)    (mean-over-C + layout fold) applied to W_gnn1, zero-padded cols
    # b1/b2:      (1, Dpad)     GNN biases (zero-padded)
    # w2_ref:     (Dpad, Dpad)  W_gnn2 (zero-padded rows+cols)
    # pn_ref:     (Dpad, Dpad)  per-BN-channel averaging matrix (1/F within a channel group)
    # gamma/beta: (1, Dpad)     BatchNorm2d affine params per column (zero-padded)
    # exp_ref:    (Dpad, DP)    exact one-hot expansion back to the interleaved PyTorch layout
    x = x_ref[...]                                                          # (B, DP)
    B = x.shape[0]
    D = w2_ref.shape[0]                                                     # = D_PAD
    inv_b = jnp.float32(1.0 / B)

    # ---- GNN1 (indicator == 0): mean over electrodes folded into w1e ----
    h = jnp.dot(x, w1e_ref[...], preferred_element_type=jnp.float32) + b1_ref[...]   # (B, Dpad)

    # ---- relu; rows are identical across C, so GNN2's mean-over-C is the identity ----
    h = jnp.maximum(h, 0.0)

    # ---- GNN2 ----
    g = jnp.dot(h, w2_ref[...], preferred_element_type=jnp.float32) + b2_ref[...]    # (B, Dpad)

    # ---- BatchNorm2d(out_dim), training-mode stats (the C axis holds identical copies) ----
    gs = jnp.sum(g, axis=0, keepdims=True)            # (1, Dpad)  sum_b g
    qs = jnp.sum(g * g, axis=0, keepdims=True)        # (1, Dpad)  sum_b g^2
    # stack the two statistic rows without a sublane-unaligned concatenate
    row = jax.lax.broadcasted_iota(jnp.int32, (2, D), 0)
    stacked = jnp.where(row == 0, gs, qs) * inv_b     # (2, Dpad): [E_b[g] ; E_b[g^2]]
    stats = jnp.dot(stacked, pn_ref[...], preferred_element_type=jnp.float32)  # channel-group avg
    mean_d = stats[0:1]                               # (1, Dpad)
    var_d = stats[1:2] - mean_d * mean_d              # (1, Dpad)  biased (training) variance
    var_d = jnp.maximum(var_d, 0.0)                   # guard f32 cancellation going negative
    scale = jax.lax.rsqrt(var_d + EPS) * gamma_ref[...]
    g = (g - mean_d) * scale + beta_ref[...]

    # ---- relu, broadcast across C (exact one-hot expansion), residual add ----
    g = jnp.maximum(g, 0.0)
    o_ref[...] = x + jnp.dot(g, exp_ref[...], preferred_element_type=jnp.float32)


def prepare_params(params, T, C, Ff, d_pad=D_PAD):
    """One-time folding of layout / BN bookkeeping into kernel-ready, lane-padded constants."""
    W1, b1, W2, b2, gamma, beta = params
    D = T * Ff
    DP = T * C * Ff
    assert d_pad >= D
    pc = d_pad - D                                    # zero-padding on the D axis

    # W1_eff[(t*C + c)*F + f, :] = W1[t*F + f, :] / C   (exact row tiling + 1/C scale)
    W1_eff = jnp.broadcast_to((W1 / C).reshape(T, 1, Ff, D), (T, C, Ff, D)).reshape(DP, D)
    W1_eff = jnp.pad(W1_eff, ((0, 0), (0, pc)))                                       # (DP, Dpad)

    # Expansion E[d, (t*C + c)*F + f] = 1 iff d == t*F + f  (broadcast over electrodes)
    eyeD = jnp.eye(D, dtype=jnp.float32)
    E = jnp.broadcast_to(eyeD.reshape(T, 1, Ff, D), (T, C, Ff, D)).reshape(DP, D).T   # (D, DP)
    E = jnp.pad(E, ((0, pc), (0, 0)))                                                 # (Dpad, DP)

    # Per-channel group averaging: Pn[d, d'] = 1/F iff d // F == d' // F
    S = jnp.repeat(jnp.eye(T, dtype=jnp.float32), Ff, axis=0)                          # (D, T)
    Pn = jnp.pad((S @ S.T) / Ff, ((0, pc), (0, pc)))                                   # (Dpad, Dpad)

    W2p = jnp.pad(W2, ((0, pc), (0, pc)))                                               # (Dpad, Dpad)
    b1p = jnp.pad(b1.reshape(1, D), ((0, 0), (0, pc)))
    b2p = jnp.pad(b2.reshape(1, D), ((0, 0), (0, pc)))
    gamma_d = jnp.pad(jnp.repeat(gamma, Ff).reshape(1, D), ((0, 0), (0, pc)))
    beta_d = jnp.pad(jnp.repeat(beta, Ff).reshape(1, D), ((0, 0), (0, pc)))
    return (W1_eff, b1p, W2p, b2p, Pn, gamma_d, beta_d, E)


def spatial_layer_forward(x, prepared):
    """x: (B, T, C, F) float32, matching the PyTorch module's input convention.

    Best perf when B is a multiple of 8 (f32 sublane tile); correct for any B.
    """
    B, T, C, Ff = x.shape
    DP = T * C * Ff
    W1_eff, b1, W2, b2, Pn, gamma_d, beta_d, E = prepared

    x_flat = x.reshape(B, DP)     # contiguous merge -> metadata-only (no transpose HBM pass)
    vmem = pl.BlockSpec(memory_space=pltpu.MemorySpace.VMEM)
    out_flat = pl.pallas_call(
        spatial_layer_kernel,
        out_shape=jax.ShapeDtypeStruct((B, DP), jnp.float32),
        in_specs=[vmem] * 9,
        out_specs=vmem,
        input_output_aliases={0: 0},
    )(x_flat, W1_eff, b1, W2, b2, Pn, gamma_d, beta_d, E)
    return out_flat.reshape(B, T, C, Ff)


def reference_forward(x, params):
    """Plain-JAX transcription of the PyTorch forward (indicator=0, training-mode BN)."""
    W1, b1, W2, b2, gamma, beta = params
    B, T, C, Ff = x.shape

    def gnn(xin, W, bv):
        xr = jnp.transpose(xin, (0, 2, 1, 3)).reshape(B, C, T * Ff)
        adj2 = jnp.ones((B, C, C), jnp.float32) / C
        y = jnp.einsum('bij,bjd->bid', adj2, xr)
        y = y @ W + bv
        return jnp.transpose(y.reshape(B, C, T, Ff), (0, 2, 1, 3))

    x2 = gnn(x, W1, b1)
    x2 = jnp.maximum(x2, 0.0)
    x2 = gnn(x2, W2, b2)
    mean = jnp.mean(x2, axis=(0, 2, 3), keepdims=True)
    var = jnp.mean((x2 - mean) ** 2, axis=(0, 2, 3), keepdims=True)
    x2 = (x2 - mean) * jax.lax.rsqrt(var + EPS)
    x2 = x2 * gamma.reshape(1, T, 1, 1) + beta.reshape(1, T, 1, 1)
    x2 = jnp.maximum(x2, 0.0)
    return x + x2


def init_params(key, in_dim, out_dim):
    """Deterministic synthetic init matching the PyTorch shapes (used parameters only)."""
    D_in, D_out = in_dim * 7, out_dim * 7
    k1, k2, k3, k4 = jax.random.split(key, 4)
    bound = float(np.sqrt(6.0 / (D_in + D_out)))            # xavier_uniform_
    W1 = jax.random.uniform(k1, (D_in, D_out), jnp.float32, -bound, bound)
    W2 = jax.random.uniform(k2, (D_in, D_out), jnp.float32, -bound, bound)
    b1 = jax.random.normal(k3, (D_out,), jnp.float32)
    b2 = jax.random.normal(k4, (D_out,), jnp.float32)
    gamma = jnp.ones((out_dim,), jnp.float32)                # BatchNorm2d affine init
    beta = jnp.zeros((out_dim,), jnp.float32)
    return (W1, b1, W2, b2, gamma, beta)


if __name__ == "__main__":
    # shapes implied by the module: T = in_dim = out_dim, C = 8 electrodes, F = 7 features.
    # B = 8 fills the f32 sublane tile / MXU LHS rows (per review), still a small example.
    B, in_dim, out_dim = 8, 8, 8
    T, C, Ff = in_dim, 8, 7

    key = jax.random.PRNGKey(0)
    kx, kp = jax.random.split(key)
    x = jax.random.normal(kx, (B, T, C, Ff), jnp.float32)
    params = init_params(kp, in_dim, out_dim)

    ref = reference_forward(x, params)               # plain-JAX ground truth

    prepared = prepare_params(params, T, C, Ff)      # hoisted one-time constant folding + padding
    fwd = jax.jit(spatial_layer_forward)
    out = jax.block_until_ready(fwd(x, prepared))

    assert out.shape == x.shape
    np.testing.assert_allclose(np.asarray(out), np.asarray(ref), rtol=1e-4, atol=1e-4)
    print("KERNEL_OK")
</pallas_src>

<mosaic_0001>
module attributes {stable_mosaic.version = 11 : i64} {
  func.func @spatial_layer_kernel(%arg0: memref<8x448xf32, #tpu.memory_space<vmem>>, %arg1: memref<448x128xf32, #tpu.memory_space<vmem>>, %arg2: memref<1x128xf32, #tpu.memory_space<vmem>>, %arg3: memref<128x128xf32, #tpu.memory_space<vmem>>, %arg4: memref<1x128xf32, #tpu.memory_space<vmem>>, %arg5: memref<128x128xf32, #tpu.memory_space<vmem>>, %arg6: memref<1x128xf32, #tpu.memory_space<vmem>>, %arg7: memref<1x128xf32, #tpu.memory_space<vmem>>, %arg8: memref<128x448xf32, #tpu.memory_space<vmem>>, %arg9: memref<8x448xf32, #tpu.memory_space<vmem>>) attributes {dimension_semantics = [], scalar_prefetch = 0 : i64, scratch_operands = 0 : i64, tpu.core_type = #tpu.core_type<tc>} {
    %c0 = arith.constant 0 : index
    %c0_0 = arith.constant 0 : index
    %0 = vector.load %arg0[%c0, %c0_0] : memref<8x448xf32, #tpu.memory_space<vmem>>, vector<8x448xf32>
    %c0_1 = arith.constant 0 : index
    %c0_2 = arith.constant 0 : index
    %1 = vector.load %arg1[%c0_1, %c0_2] : memref<448x128xf32, #tpu.memory_space<vmem>>, vector<448x128xf32>
    %cst = arith.constant dense<0.000000e+00> : vector<8x128xf32>
    %2 = tpu.matmul %0, %1, %cst {dimension_numbers = #tpu.dot_dimension_numbers<[1], [0], [0], [1], [0, 0, 1, 1], [], []>} : vector<8x448xf32>, vector<448x128xf32>, vector<8x128xf32> -> vector<8x128xf32>
    %c0_3 = arith.constant 0 : index
    %c0_4 = arith.constant 0 : index
    %3 = vector.load %arg2[%c0_3, %c0_4] : memref<1x128xf32, #tpu.memory_space<vmem>>, vector<1x128xf32>
    %4 = vector.broadcast %3 : vector<1x128xf32> to vector<8x128xf32>
    %5 = arith.addf %2, %4 : vector<8x128xf32>
    %cst_5 = arith.constant 0.000000e+00 : f32
    %6 = vector.broadcast %cst_5 : f32 to vector<8x128xf32>
    %7 = arith.maximumf %5, %6 : vector<8x128xf32>
    %c0_6 = arith.constant 0 : index
    %c0_7 = arith.constant 0 : index
    %8 = vector.load %arg3[%c0_6, %c0_7] : memref<128x128xf32, #tpu.memory_space<vmem>>, vector<128x128xf32>
    %cst_8 = arith.constant dense<0.000000e+00> : vector<8x128xf32>
    %9 = tpu.matmul %7, %8, %cst_8 {dimension_numbers = #tpu.dot_dimension_numbers<[1], [0], [0], [1], [0, 0, 1, 1], [], []>} : vector<8x128xf32>, vector<128x128xf32>, vector<8x128xf32> -> vector<8x128xf32>
    %c0_9 = arith.constant 0 : index
    %c0_10 = arith.constant 0 : index
    %10 = vector.load %arg4[%c0_9, %c0_10] : memref<1x128xf32, #tpu.memory_space<vmem>>, vector<1x128xf32>
    %11 = vector.broadcast %10 : vector<1x128xf32> to vector<8x128xf32>
    %12 = arith.addf %9, %11 : vector<8x128xf32>
    %cst_11 = arith.constant dense<0.000000e+00> : vector<128xf32>
    %13 = vector.multi_reduction <add>, %12, %cst_11 [0] : vector<8x128xf32> to vector<128xf32>
    %14 = vector.shape_cast %13 : vector<128xf32> to vector<1x128xf32>
    %15 = arith.mulf %12, %12 : vector<8x128xf32>
    %cst_12 = arith.constant dense<0.000000e+00> : vector<128xf32>
    %16 = vector.multi_reduction <add>, %15, %cst_12 [0] : vector<8x128xf32> to vector<128xf32>
    %17 = vector.shape_cast %16 : vector<128xf32> to vector<1x128xf32>
    %18 = tpu.iota {dimensions = array<i32: 0>} : vector<2x128xi32>
    %c0_i32 = arith.constant 0 : i32
    %19 = vector.broadcast %c0_i32 : i32 to vector<2x128xi32>
    %20 = arith.cmpi eq, %18, %19 : vector<2x128xi32>
    %21 = vector.shape_cast %14 : vector<1x128xf32> to vector<1x128xf32>
    %22 = vector.broadcast %21 : vector<1x128xf32> to vector<2x128xf32>
    %23 = vector.shape_cast %17 : vector<1x128xf32> to vector<1x128xf32>
    %24 = vector.broadcast %23 : vector<1x128xf32> to vector<2x128xf32>
    %25 = arith.select %20, %22, %24 : vector<2x128xi1>, vector<2x128xf32>
    %cst_13 = arith.constant 1.250000e-01 : f32
    %26 = vector.broadcast %cst_13 : f32 to vector<2x128xf32>
    %27 = arith.mulf %25, %26 : vector<2x128xf32>
    %c0_14 = arith.constant 0 : index
    %c0_15 = arith.constant 0 : index
    %28 = vector.load %arg5[%c0_14, %c0_15] : memref<128x128xf32, #tpu.memory_space<vmem>>, vector<128x128xf32>
    %cst_16 = arith.constant dense<0.000000e+00> : vector<2x128xf32>
    %29 = tpu.matmul %27, %28, %cst_16 {dimension_numbers = #tpu.dot_dimension_numbers<[1], [0], [0], [1], [0, 0, 1, 1], [], []>} : vector<2x128xf32>, vector<128x128xf32>, vector<2x128xf32> -> vector<2x128xf32>
    %30 = vector.extract_strided_slice %29 {offsets = [0, 0], sizes = [1, 128], strides = [1, 1]} : vector<2x128xf32> to vector<1x128xf32>
    %31 = vector.extract_strided_slice %29 {offsets = [1, 0], sizes = [1, 128], strides = [1, 1]} : vector<2x128xf32> to vector<1x128xf32>
    %32 = arith.mulf %30, %30 : vector<1x128xf32>
    %33 = arith.subf %31, %32 : vector<1x128xf32>
    %cst_17 = arith.constant 0.000000e+00 : f32
    %34 = vector.broadcast %cst_17 : f32 to vector<1x128xf32>
    %35 = arith.maximumf %33, %34 : vector<1x128xf32>
    %cst_18 = arith.constant 9.99999974E-6 : f32
    %36 = vector.broadcast %cst_18 : f32 to vector<1x128xf32>
    %37 = arith.addf %35, %36 : vector<1x128xf32>
    %38 = math.rsqrt %37 : vector<1x128xf32>
    %c0_19 = arith.constant 0 : index
    %c0_20 = arith.constant 0 : index
    %39 = vector.load %arg6[%c0_19, %c0_20] : memref<1x128xf32, #tpu.memory_space<vmem>>, vector<1x128xf32>
    %40 = arith.mulf %38, %39 : vector<1x128xf32>
    %41 = vector.broadcast %30 : vector<1x128xf32> to vector<8x128xf32>
    %42 = arith.subf %12, %41 : vector<8x128xf32>
    %43 = vector.broadcast %40 : vector<1x128xf32> to vector<8x128xf32>
    %44 = arith.mulf %42, %43 : vector<8x128xf32>
    %c0_21 = arith.constant 0 : index
    %c0_22 = arith.constant 0 : index
    %45 = vector.load %arg7[%c0_21, %c0_22] : memref<1x128xf32, #tpu.memory_space<vmem>>, vector<1x128xf32>
    %46 = vector.broadcast %45 : vector<1x128xf32> to vector<8x128xf32>
    %47 = arith.addf %44, %46 : vector<8x128xf32>
    %cst_23 = arith.constant 0.000000e+00 : f32
    %48 = vector.broadcast %cst_23 : f32 to vector<8x128xf32>
    %49 = arith.maximumf %47, %48 : vector<8x128xf32>
    %c0_24 = arith.constant 0 : index
    %c0_25 = arith.constant 0 : index
    %50 = vector.load %arg8[%c0_24, %c0_25] : memref<128x448xf32, #tpu.memory_space<vmem>>, vector<128x448xf32>
    %cst_26 = arith.constant dense<0.000000e+00> : vector<8x448xf32>
    %51 = tpu.matmul %49, %50, %cst_26 {dimension_numbers = #tpu.dot_dimension_numbers<[1], [0], [0], [1], [0, 0, 1, 1], [], []>} : vector<8x128xf32>, vector<128x448xf32>, vector<8x448xf32> -> vector<8x448xf32>
    %52 = arith.addf %0, %51 : vector<8x448xf32>
    %c0_27 = arith.constant 0 : index
    %c0_28 = arith.constant 0 : index
    %53 = vector.load %arg9[%c0_27, %c0_28] : memref<8x448xf32, #tpu.memory_space<vmem>>, vector<8x448xf32>
    tpu.vector_store %arg9[%c0_27, %c0_28], %52 {strides = array<i32>} : memref<8x448xf32, #tpu.memory_space<vmem>>, vector<8x448xf32>,
    return
  }
}

</mosaic_0001>

<bundles_post_ra>
// kernel: spatial_layer_forward.1
= control target key start
LH: loop header
LB: loop body
LE: loop exit
PB: predicated region body
PF: predicated region fallthrough
CT: control target
= control target key end

     0   :  { %v1023_v0 = vmov 0.0|0.0   ;;  %vm99_vm0 = vcmask 523264   ;;  %vm1024_vm1 = vmmov 0   ;;  %s1630_s1 = inlined_call_operand.vmem [shape: f32[448,128], index: 1, kind: input, shape index: {}]   ;;  %s1631_s0 = inlined_call_operand.vmem [shape: f32[8,448], index: 0, kind: input, shape index: {}, may-alias: {0,9}]   ;;  %s1632_s3 = inlined_call_operand.vmem [shape: f32[128,128], index: 3, kind: input, shape index: {}]   ;;  %s1633_s5 = inlined_call_operand.vmem [shape: f32[128,128], index: 5, kind: input, shape index: {}]   ;;  %s1634_s2 = inlined_call_operand.vmem [shape: f32[1,128], index: 2, kind: input, shape index: {}]   ;;  %s1635_s4 = inlined_call_operand.vmem [shape: f32[1,128], index: 4, kind: input, shape index: {}]   ;;  %s1636_s8 = inlined_call_operand.vmem [shape: f32[128,448], index: 8, kind: input, shape index: {}]   ;;  %s1637_s6 = inlined_call_operand.vmem [shape: f32[1,128], index: 6, kind: input, shape index: {}]   ;;  %s1638_s7 = inlined_call_operand.vmem [shape: f32[1,128], index: 7, kind: input, shape index: {}]   ;;  %s1639_s9 = inlined_call_operand.vmem [shape: f32[8,448], index: 9, kind: output, shape index: {}, may-alias: {0,9}]  }
   0x1   :  { %870 = vmatprep.subr.bf16.mxu1 %v1023_v0  ;;  %v68_v1 = vld [vmem:[%s1630_s1 + $0x100] sm:$0xff]  ;;  %v69_v2 = vld [vmem:[%s1630_s1 + $0x108] sm:$0xff]  ;;  %v70_v3 = vld [vmem:[%s1630_s1 + $0x110] sm:$0xff] }
   0x2   :  { %v871_v4 = vpack.c.bf16 %v69_v2, %v68_v1  ;;  %v71_v5 = vld [vmem:[%s1630_s1 + $0x118] sm:$0xff]  ;;  %v52_v6 = vld [vmem:[%s1630_s1 + $0x80] sm:$0xff]  ;;  %v53_v7 = vld [vmem:[%s1630_s1 + $0x88] sm:$0xff] }
   0x3   :  { %v36_v8 = vld [vmem:[%s1630_s1] sm:$0xff]  ;;  %v874_v9 = vpack.c.bf16 %v71_v5, %v70_v3  ;;  %v73_v11 = vld [vmem:[%s1630_s1 + $0x128] sm:$0xff]  ;;  %v838_v12 = vpack.c.bf16 %v53_v7, %v52_v6  ;;  %v54_v15 = vld [vmem:[%s1630_s1 + $0x90] sm:$0xff] }
   0x4   :  { %872 = vmatpush1.bf16.msra.mxu1 %v871_v4  ;;  %v72_v10 = vld [vmem:[%s1630_s1 + $0x120] sm:$0xff]  ;;  %v37_v13 = vld [vmem:[%s1630_s1 + $0x8] sm:$0xff]  ;;  %v55_v16 = vld [vmem:[%s1630_s1 + $0x98] sm:$0xff] }
   0x5   :  { %873 = vmatprep.subr.bf16.mxu1 %v1023_v0  ;;  %v840_v14 = vpack.c.bf16 %v37_v13, %v36_v8  ;;  %v38_v17 = vld [vmem:[%s1630_s1 + $0x10] sm:$0xff]  ;;  %839 = vmatprep.subr.bf16.mxu0 %v838_v12  ;;  %v842_v18 = vpack.c.bf16 %v55_v16, %v54_v15  ;;  %v39_v19 = vld [vmem:[%s1630_s1 + $0x18] sm:$0xff]  ;;  %v56_v21 = vld [vmem:[%s1630_s1 + $0xa0] sm:$0xff]  ;;  %v877_v23 = vpack.c.bf16 %v73_v11, %v72_v10 }
   0x6   :  { %v844_v20 = vpack.c.bf16 %v39_v19, %v38_v17  ;;  %v57_v22 = vld [vmem:[%s1630_s1 + $0xa8] sm:$0xff]  ;;  %v74_v24 = vld [vmem:[%s1630_s1 + $0x130] sm:$0xff]  ;;  %v40_v26 = vld [vmem:[%s1630_s1 + $0x20] sm:$0xff] }
   0x7   :  { %841 = vmatpush3.bf16.msra.mxu0 %v840_v14  ;;  %v846_v25 = vpack.c.bf16 %v57_v22, %v56_v21  ;;  %v41_v27 = vld [vmem:[%s1630_s1 + $0x28] sm:$0xff]  ;;  %v75_v28 = vld [vmem:[%s1630_s1 + $0x138] sm:$0xff]  ;;  %v58_v29 = vld [vmem:[%s1630_s1 + $0xb0] sm:$0xff] }
   0x8   :  { %875 = vmatpush1.bf16.msra.mxu1 %v874_v9  ;;  %843 = vmatprep.subr.bf16.mxu0 %v842_v18  ;;  %v59_v30 = vld [vmem:[%s1630_s1 + $0xb8] sm:$0xff]  ;;  %v848_v31 = vpack.c.bf16 %v41_v27, %v40_v26  ;;  %v880_v32 = vpack.c.bf16 %v75_v28, %v74_v24  ;;  %v76_v33 = vld [vmem:[%s1630_s1 + $0x140] sm:$0xff]  ;;  %v42_v35 = vld [vmem:[%s1630_s1 + $0x30] sm:$0xff] }
   0x9   :  { %876 = vmatprep.subr.bf16.mxu1 %v1023_v0  ;;  %v850_v34 = vpack.c.bf16 %v59_v30, %v58_v29  ;;  %v43_v36 = vld [vmem:[%s1630_s1 + $0x38] sm:$0xff]  ;;  %v77_v37 = vld [vmem:[%s1630_s1 + $0x148] sm:$0xff]  ;;  %v60_v38 = vld [vmem:[%s1630_s1 + $0xc0] sm:$0xff] }
   0xa   :  { %v61_v39 = vld [vmem:[%s1630_s1 + $0xc8] sm:$0xff]  ;;  %v852_v40 = vpack.c.bf16 %v43_v36, %v42_v35  ;;  %v883_v41 = vpack.c.bf16 %v77_v37, %v76_v33  ;;  %v78_v42 = vld [vmem:[%s1630_s1 + $0x150] sm:$0xff]  ;;  %v44_v44 = vld [vmem:[%s1630_s1 + $0x40] sm:$0xff] }
   0xb   :  { %845 = vmatpush3.bf16.msra.mxu0 %v844_v20  ;;  %v854_v43 = vpack.c.bf16 %v61_v39, %v60_v38  ;;  %v45_v45 = vld [vmem:[%s1630_s1 + $0x48] sm:$0xff]  ;;  %v79_v46 = vld [vmem:[%s1630_s1 + $0x158] sm:$0xff]  ;;  %v62_v47 = vld [vmem:[%s1630_s1 + $0xd0] sm:$0xff] }
   0xc   :  { %878 = vmatpush1.bf16.msra.mxu1 %v877_v23  ;;  %847 = vmatprep.subr.bf16.mxu0 %v846_v25  ;;  %v63_v48 = vld [vmem:[%s1630_s1 + $0xd8] sm:$0xff]  ;;  %v1186_v49 = vld [vmem:[%s1631_s0 + $0x8] sm:$0xff]  ;;  %v80_v50 = vld [vmem:[%s1630_s1 + $0x160] sm:$0xff]  ;;  %v856_v51 = vpack.c.bf16 %v45_v45, %v44_v44  ;;  %v886_v52 = vpack.c.bf16 %v79_v46, %v78_v42 }
   0xd   :  { %879 = vmatprep.subr.bf16.mxu1 %v1023_v0  ;;  %167 = vmatprep.mubr.f32.mxu0 %v1186_v49  ;;  %v858_v53 = vpack.c.bf16 %v63_v48, %v62_v47  ;;  %v46_v54 = vld [vmem:[%s1630_s1 + $0x50] sm:$0xff]  ;;  %v47_v55 = vld [vmem:[%s1630_s1 + $0x58] sm:$0xff]  ;;  %v81_v57 = vld [vmem:[%s1630_s1 + $0x168] sm:$0xff] }
   0xe   :  { %v1201_v56 = vld [vmem:[%s1631_s0 + $0x18] sm:$0xff]  ;;  %v64_v58 = vld [vmem:[%s1630_s1 + $0xe0] sm:$0xff]  ;;  %v65_v59 = vld [vmem:[%s1630_s1 + $0xe8] sm:$0xff]  ;;  %v860_v60 = vpack.c.bf16 %v47_v55, %v46_v54  ;;  %v889_v61 = vpack.c.bf16 %v81_v57, %v80_v50 }
   0xf   :  { %849 = vmatpush3.bf16.msra.mxu0 %v848_v31  ;;  %695 = vmatprep.mubr.msk.f32.mxu1 %vm99_vm0, %v1201_v56  ;;  %v82_v62 = vld [vmem:[%s1630_s1 + $0x170] sm:$0xff]  ;;  %v862_v63 = vpack.c.bf16 %v65_v59, %v64_v58  ;;  %v48_v1 = vld [vmem:[%s1630_s1 + $0x60] sm:$0xff]  ;;  %v49_v2 = vld [vmem:[%s1630_s1 + $0x68] sm:$0xff] }
  0x10   :  { %881 = vmatpush1.bf16.msra.mxu1 %v880_v32  ;;  %851 = vmatprep.subr.bf16.mxu0 %v850_v34  ;;  %v83_v3 = vld [vmem:[%s1630_s1 + $0x178] sm:$0xff]  ;;  %v66_v4 = vld [vmem:[%s1630_s1 + $0xf0] sm:$0xff]  ;;  %v864_v6 = vpack.c.bf16 %v49_v2, %v48_v1  ;;  %v84_v11 = vld [vmem:[%s1630_s1 + $0x180] sm:$0xff] }
  0x11   :  { %882 = vmatprep.subr.bf16.mxu1 %v1023_v0  ;;  %v67_v5 = vld [vmem:[%s1630_s1 + $0xf8] sm:$0xff]  ;;  %v892_v7 = vpack.c.bf16 %v83_v3, %v82_v62  ;;  %v50_v9 = vld [vmem:[%s1630_s1 + $0x70] sm:$0xff]  ;;  %v85_v12 = vld [vmem:[%s1630_s1 + $0x188] sm:$0xff] }
  0x12   :  { %v866_v8 = vpack.c.bf16 %v67_v5, %v66_v4  ;;  %v51_v10 = vld [vmem:[%s1630_s1 + $0x78] sm:$0xff]  ;;  %v895_v14 = vpack.c.bf16 %v85_v12, %v84_v11  ;;  %v244_v15 = vld [vmem:[%s1632_s3] sm:$0xff]  ;;  %v245_v16 = vld [vmem:[%s1632_s3 + $0x8] sm:$0xff] }
  0x13   :  { %853 = vmatpush3.bf16.msra.mxu0 %v852_v40  ;;  %v868_v13 = vpack.c.bf16 %v51_v10, %v50_v9  ;;  %v86_v17 = vld [vmem:[%s1630_s1 + $0x190] sm:$0xff]  ;;  %v87_v18 = vld [vmem:[%s1630_s1 + $0x198] sm:$0xff]  ;;  %v1263_v19 = vld [vmem:[%s1631_s0] sm:$0xff]  ;;  %v907_v20 = vpack.c.bf16 %v245_v16, %v244_v15 }
  0x14   :  { %884 = vmatpush1.bf16.msra.mxu1 %v883_v41  ;;  %855 = vmatprep.subr.bf16.mxu0 %v854_v43  ;;  %v898_v21 = vpack.c.bf16 %v87_v18, %v86_v17  ;;  %v246_v22 = vld [vmem:[%s1632_s3 + $0x10] sm:$0xff]  ;;  %v247_v23 = vld [vmem:[%s1632_s3 + $0x18] sm:$0xff]  ;;  %v88_v24 = vld [vmem:[%s1630_s1 + $0x1a0] sm:$0xff] }
  0x15   :  { %885 = vmatprep.subr.bf16.mxu1 %v1023_v0  ;;  %v89_v25 = vld [vmem:[%s1630_s1 + $0x1a8] sm:$0xff]  ;;  %v910_v26 = vpack.c.bf16 %v247_v23, %v246_v22  ;;  %v248_v28 = vld [vmem:[%s1632_s3 + $0x20] sm:$0xff]  ;;  %v90_v30 = vld [vmem:[%s1630_s1 + $0x1b0] sm:$0xff] }
  0x16   :  { %v901_v27 = vpack.c.bf16 %v89_v25, %v88_v24  ;;  %v249_v29 = vld [vmem:[%s1632_s3 + $0x28] sm:$0xff]  ;;  %v91_v31 = vld [vmem:[%s1630_s1 + $0x1b8] sm:$0xff]  ;;  %v250_v34 = vld [vmem:[%s1632_s3 + $0x30] sm:$0xff] }
  0x17   :  { %857 = vmatpush3.bf16.msra.mxu0 %v856_v51  ;;  %v913_v32 = vpack.c.bf16 %v249_v29, %v248_v28  ;;  %v904_v33 = vpack.c.bf16 %v91_v31, %v90_v30  ;;  %v251_v35 = vld [vmem:[%s1632_s3 + $0x38] sm:$0xff]  ;;  %v1305_v37 = vld [vmem:[%s1631_s0 + $0x10] sm:$0xff]  ;;  %v252_v38 = vld [vmem:[%s1632_s3 + $0x40] sm:$0xff]  ;;  %v1025_v51 = vmov 0.0  }
  0x18   :  { %887 = vmatpush1.bf16.msra.mxu1 %v886_v52  ;;  %859 = vmatprep.subr.bf16.mxu0 %v858_v53  ;;  %v916_v36 = vpack.c.bf16 %v251_v35, %v250_v34  ;;  %v253_v39 = vld [vmem:[%s1632_s3 + $0x48] sm:$0xff]  ;;  %v254_v41 = vld [vmem:[%s1632_s3 + $0x50] sm:$0xff]  ;;  %v255_v42 = vld [vmem:[%s1632_s3 + $0x58] sm:$0xff] }
  0x19   :  { %888 = vmatprep.subr.bf16.mxu1 %v1023_v0  ;;  %v919_v40 = vpack.c.bf16 %v253_v39, %v252_v38  ;;  %v922_v43 = vpack.c.bf16 %v255_v42, %v254_v41  ;;  %v256_v44 = vld [vmem:[%s1632_s3 + $0x60] sm:$0xff]  ;;  %v257_v45 = vld [vmem:[%s1632_s3 + $0x68] sm:$0xff]  ;;  %v258_v47 = vld [vmem:[%s1632_s3 + $0x70] sm:$0xff] }
  0x1a   :  { %v925_v46 = vpack.c.bf16 %v257_v45, %v256_v44  ;;  %v259_v48 = vld [vmem:[%s1632_s3 + $0x78] sm:$0xff]  ;;  %v355_v52 = vld [vmem:[%s1633_s5] sm:$0xff]  ;;  %v356_v53 = vld [vmem:[%s1633_s5 + $0x8] sm:$0xff] }
  0x1b   :  { %861 = vmatpush3.bf16.msra.mxu0 %v860_v60  ;;  %v928_v50 = vpack.c.bf16 %v259_v48, %v258_v47  ;;  %v357_v54 = vld [vmem:[%s1633_s5 + $0x10] sm:$0xff]  ;;  %v931_v55 = vpack.c.bf16 %v356_v53, %v355_v52  ;;  %v358_v57 = vld [vmem:[%s1633_s5 + $0x18] sm:$0xff]  ;;  %v359_v59 = vld [vmem:[%s1633_s5 + $0x20] sm:$0xff] }
  0x1c   :  { %890 = vmatpush1.bf16.msra.mxu1 %v889_v61  ;;  %863 = vmatprep.subr.bf16.mxu0 %v862_v63  ;;  %v934_v58 = vpack.c.bf16 %v358_v57, %v357_v54  ;;  %v360_v60 = vld [vmem:[%s1633_s5 + $0x28] sm:$0xff]  ;;  %v694_v2 = vld [vmem:[%s1634_s2] ss:$0 sm:$0xff]  ;;  %v362_v9 = vld [vmem:[%s1633_s5 + $0x38] sm:$0xff] }
  0x1d   :  { %891 = vmatprep.subr.bf16.mxu1 %v1023_v0  ;;  %v937_v61 = vpack.c.bf16 %v360_v60, %v359_v59  ;;  %v363_v11 = vld [vmem:[%s1633_s5 + $0x40] sm:$0xff]  ;;  %v364_v12 = vld [vmem:[%s1633_s5 + $0x48] sm:$0xff]  ;;  %v366_v15 = vld [vmem:[%s1633_s5 + $0x58] sm:$0xff] }
  0x1e   :  { %v367_v17 = vld [vmem:[%s1633_s5 + $0x60] sm:$0xff]  ;;  %v368_v18 = vld [vmem:[%s1633_s5 + $0x68] sm:$0xff]  ;;  %v370_v22 = vld [vmem:[%s1633_s5 + $0x78] sm:$0xff] }
  0x1f   :  { %865 = vmatpush3.bf16.msra.mxu0 %v864_v6  ;;  %v696_v24 = vld [vmem:[%s1635_s4] ss:$0 sm:$0xff]  ;;  %v477_v45 = vld [vmem:[%s1636_s8 + $0x8] sm:$0xff]  ;;  %v479_v47 = vld [vmem:[%s1636_s8 + $0x18] sm:$0xff] }
  0x20   :  { %893 = vmatpush1.bf16.msra.mxu1 %v892_v7  ;;  %867 = vmatprep.subr.bf16.mxu0 %v866_v8  ;;  %v361_v8 = vld [vmem:[%s1633_s5 + $0x30] sm:$0xff]  ;;  %v480_v52 = vld [vmem:[%s1636_s8 + $0x20] sm:$0xff]  ;;  %v485_v59 = vld [vmem:[%s1636_s8 + $0x48] sm:$0xff] }
  0x21   :  { %894 = vmatprep.subr.bf16.mxu1 %v1023_v0  ;;  %v940_v10 = vpack.c.bf16 %v362_v9, %v361_v8  ;;  %v482_v57 = vld [vmem:[%s1636_s8 + $0x30] sm:$0xff]  ;;  %v489_v60 = vld [vmem:[%s1636_s8 + $0x68] sm:$0xff] }
  0x22   :  { %v493_v8 = vld [vmem:[%s1636_s8 + $0x88] sm:$0xff] }
  0x23   :  { %869 = vmatpush3.bf16.msra.mxu0 %v868_v13  ;;  %v943_v13 = vpack.c.bf16 %v364_v12, %v363_v11  ;;  %v497_v9 = vld [vmem:[%s1636_s8 + $0xa8] sm:$0xff]  ;;  %v499_v12 = vld [vmem:[%s1636_s8 + $0xb8] sm:$0xff] }
  0x24   :  { %896 = vmatpush1.bf16.msra.mxu1 %v895_v14  ;;  %906 = vmatprep.subr.bf16.mxu0 %v1023_v0  ;;  %v365_v14 = vld [vmem:[%s1633_s5 + $0x50] sm:$0xff]  ;;  %v962_v11 = vpack.c.bf16 %v497_v9, %v493_v8 }
  0x25   :  { %897 = vmatprep.subr.bf16.mxu1 %v1023_v0  ;;  %v946_v16 = vpack.c.bf16 %v366_v15, %v365_v14  ;;  %v496_v14 = vld [vmem:[%s1636_s8 + $0xa0] sm:$0xff]  ;;  %v530_v8 = vld [vmem:[%s1636_s8 + $0x1b0] sm:$0xff] }
  0x26   :  { %168 = vmatmul.mubr.f32.vlgmr.msra.gmra.mrb[0].mxu0 %v1263_v19 }
  0x27   :  { %908 = vmatpush3.bf16.msra.mxu0 %v907_v20  ;;  %800 = vmatprep.mubr.msk.f32.mxu0 %vm1024_vm1, %v1025_v51  ;;  %v949_v20 = vpack.c.bf16 %v368_v18, %v367_v17  ;;  %v494_v17 = vld [vmem:[%s1636_s8 + $0x90] sm:$0xff] }
  0x28   :  { %899 = vmatpush1.bf16.msra.mxu1 %v898_v21  ;;  %909 = vmatprep.subr.bf16.mxu0 %v1023_v0  ;;  %v369_v21 = vld [vmem:[%s1633_s5 + $0x70] sm:$0xff] }
  0x29   :  { %900 = vmatprep.subr.bf16.mxu1 %v1023_v0  ;;  %v952_v23 = vpack.c.bf16 %v370_v22, %v369_v21  ;;  %v498_v18 = vld [vmem:[%s1636_s8 + $0xb0] sm:$0xff]  ;;  %v501_v21 = vld [vmem:[%s1636_s8 + $0xc8] sm:$0xff] }
  0x2a   :  { %v505_v22 = vld [vmem:[%s1636_s8 + $0xe8] sm:$0xff] }
  0x2b   :  { %911 = vmatpush3.bf16.msra.mxu0 %v910_v26 }
  0x2c   :  { %902 = vmatpush1.bf16.msra.mxu1 %v901_v27  ;;  %912 = vmatprep.subr.bf16.mxu0 %v1023_v0 }
  0x2d   :  { %903 = vmatprep.subr.bf16.mxu1 %v1023_v0 }
  0x2f   :  { %914 = vmatpush3.bf16.msra.mxu0 %v913_v32  ;;  %v350_v32 = vlaneseq }
  0x30   :  { %905 = vmatpush1.bf16.msra.mxu1 %v904_v33  ;;  %915 = vmatprep.subr.bf16.mxu0 %v1023_v0 }
  0x31   :  { %930 = vmatprep.subr.bf16.mxu1 %v1023_v0 }
  0x33   :  { %238 = vmatmul.mubr.f32.vlgmr.msra.gmra.mrb[0].mxu1 %v1305_v37  ;;  %917 = vmatpush3.bf16.msra.mxu0 %v916_v36  ;;  %v1408_v36 = vshrl.u32 %v350_v32, 7  ;;  %v506_v32 = vld [vmem:[%s1636_s8 + $0xf0] sm:$0xff] }
  0x34   :  { %918 = vmatprep.subr.bf16.mxu0 %v1023_v0  ;;  %835 = vmatprep.mubr.msk.f32.mxu1 %vm1024_vm1, %v1025_v51 }
  0x35   :  { %932 = vmatpush3.bf16.msra.mxu1 %v931_v55  ;;  %vm352_vm2 = vcmp.eq.s32.totalorder %v1408_v36, 0  ;;  %v478_v55 = vld [vmem:[%s1636_s8 + $0x10] sm:$0xff] }
  0x36   :  { %933 = vmatprep.subr.bf16.mxu1 %v1023_v0 }
  0x37   :  { %920 = vmatpush3.bf16.msra.mxu0 %v919_v40 }
  0x38   :  { %921 = vmatprep.subr.bf16.mxu0 %v1023_v0 }
  0x39   :  { %935 = vmatpush3.bf16.msra.mxu1 %v934_v58  ;;  %v988_v58 = vpack.c.bf16 %v482_v57, %v478_v55 }
  0x3a   :  { %936 = vmatprep.subr.bf16.mxu1 %v1023_v0 }
  0x3b   :  { %923 = vmatpush3.bf16.msra.mxu0 %v922_v43 }
  0x3c   :  { %924 = vmatprep.subr.bf16.mxu0 %v1023_v0 }
  0x3d   :  { %938 = vmatpush3.bf16.msra.mxu1 %v937_v61  ;;  %v487_v61 = vld [vmem:[%s1636_s8 + $0x58] sm:$0xff] }
  0x3e   :  { %939 = vmatprep.subr.bf16.mxu1 %v1023_v0 }
  0x3f   :  { %926 = vmatpush3.bf16.msra.mxu0 %v925_v46  ;;  %v481_v46 = vld [vmem:[%s1636_s8 + $0x28] sm:$0xff] }
  0x40   :  { %927 = vmatprep.subr.bf16.mxu0 %v1023_v0  ;;  %v954_v48 = vpack.c.bf16 %v481_v46, %v477_v45  ;;  %v514_v45 = vld [vmem:[%s1636_s8 + $0x130] sm:$0xff] }
  0x41   :  { %941 = vmatpush3.bf16.msra.mxu1 %v940_v10  ;;  %v495_v10 = vld [vmem:[%s1636_s8 + $0x98] sm:$0xff] }
  0x42   :  { %942 = vmatprep.subr.bf16.mxu1 %v1023_v0  ;;  %v994_v15 = vpack.c.bf16 %v499_v12, %v495_v10  ;;  %v533_v10 = vld [vmem:[%s1636_s8 + $0x1c8] sm:$0xff]  ;;  %v535_v12 = vld [vmem:[%s1636_s8 + $0x1d8] sm:$0xff] }
  0x43   :  { %929 = vmatpush3.bf16.msra.mxu0 %v928_v50  ;;  %v483_v50 = vld [vmem:[%s1636_s8 + $0x38] sm:$0xff] }
  0x44   :  { %v986_v53 = vpack.c.bf16 %v483_v50, %v479_v47  ;;  %955 = vmatprep.subr.bf16.mxu0 %v954_v48  ;;  %v517_v47 = vld [vmem:[%s1636_s8 + $0x148] sm:$0xff]  ;;  %v519_v50 = vld [vmem:[%s1636_s8 + $0x158] sm:$0xff] }
  0x45   :  { %944 = vmatpush3.bf16.msra.mxu1 %v943_v13  ;;  %v492_v13 = vld [vmem:[%s1636_s8 + $0x80] sm:$0xff]  ;;  %v521_v48 = vld [vmem:[%s1636_s8 + $0x168] sm:$0xff] }
  0x46   :  { %945 = vmatprep.subr.bf16.mxu1 %v1023_v0 }
  0x49   :  { %947 = vmatpush3.bf16.msra.mxu1 %v946_v16  ;;  %v964_v16 = vpack.c.bf16 %v496_v14, %v492_v13  ;;  %v539_v14 = vld [vmem:[%s1636_s8 + $0x1f8] sm:$0xff] }
  0x4a   :  { %948 = vmatprep.subr.bf16.mxu1 %v1023_v0 }
  0x4d   :  { %950 = vmatpush3.bf16.msra.mxu1 %v949_v20  ;;  %v996_v20 = vpack.c.bf16 %v498_v18, %v494_v17  ;;  %v1014_v17 = vpack.c.bf16 %v539_v14, %v535_v12 }
  0x4e   :  { %951 = vmatprep.subr.bf16.mxu1 %v1023_v0 }
  0x51   :  { %953 = vmatpush3.bf16.msra.mxu1 %v952_v23  ;;  %v503_v23 = vld [vmem:[%s1636_s8 + $0xd8] sm:$0xff] }
  0x52   :  { %987 = vmatprep.subr.bf16.mxu1 %v986_v53  ;;  %v516_v53 = vld [vmem:[%s1636_s8 + $0x140] sm:$0xff] }
  0xf9   :  { %v731_v62 = vpop.f32.mrb[0].mxu0 }
  0xfa   :  { %v732_v63 = vpop.f32.mrb[1].mxu0 }
  0xfb   :  { %v733_v1 = vadd.f32 %v732_v63, %v731_v62  ;;  %v958_v62 = vpack.c.bf16 %v489_v60, %v485_v59  ;;  %v491_v63 = vld [vmem:[%s1636_s8 + $0x78] sm:$0xff]  ;;  %v522_v59 = vld [vmem:[%s1636_s8 + $0x170] sm:$0xff] }
  0xfd   :  { %v170_v3 = vadd.f32 %v733_v1, %v694_v2  ;;  %v484_v1 = vld [vmem:[%s1636_s8 + $0x40] sm:$0xff] }
  0xfe   :  { %v488_v2 = vld [vmem:[%s1636_s8 + $0x60] sm:$0xff] }
 0x106   :  { %v239_v4 = vpop.f32.mrb[0].mxu1 }
 0x107   :  { %v240_v5 = vadd.f32 %v239_v4, %v170_v3  ;;  %v241_v6 = vpop.f32.mrb[1].mxu1  ;;  %v990_v3 = vpack.c.bf16 %v491_v63, %v487_v61  ;;  %v960_v4 = vpack.c.bf16 %v488_v2, %v484_v1  ;;  %v525_v61 = vld [vmem:[%s1636_s8 + $0x188] sm:$0xff]  ;;  %v527_v63 = vld [vmem:[%s1636_s8 + $0x198] sm:$0xff] }
 0x108   :  { %v490_v6 = vld [vmem:[%s1636_s8 + $0x70] sm:$0xff]  ;;  %v531_v2 = vld [vmem:[%s1636_s8 + $0x1b8] sm:$0xff] }
 0x109   :  { %v243_v7 = vmax.f32 %v240_v5, 0.0  ;;  %v486_v5 = vld [vmem:[%s1636_s8 + $0x50] sm:$0xff] }
 0x10b   :  { %801 = vmatmul.mubr.f32.vlgmr.msra.gmra.mrb[2].mxu0 %v243_v7  ;;  %v992_v7 = vpack.c.bf16 %v490_v6, %v486_v5  ;;  %v1010_v5 = vpack.c.bf16 %v531_v2, %v527_v63 }
 0x10c   :  { %604 = vmatprep.mubr.f32.mxu0 %v1025_v51 }
 0x1de   :  { %v333_v25 = vpop.f32.mrb[2].mxu0 }
 0x1df   :  { %v1402_v26 = vadd.f32 %v696_v24, %v333_v25  ;;  %v802_v27 = vpop.f32.mrb[3].mxu0  ;;  %v966_v24 = vpack.c.bf16 %v505_v22, %v501_v21  ;;  %v507_v25 = vld [vmem:[%s1636_s8 + $0xf8] sm:$0xff]  ;;  %v538_v21 = vld [vmem:[%s1636_s8 + $0x1f0] sm:$0xff] }
 0x1e0   :  { %v500_v27 = vld [vmem:[%s1636_s8 + $0xc0] sm:$0xff] }
 0x1e1   :  { %v337_v28 = vrot.slane %v1402_v26, 4  ;;  %v343_v29 = vmul.f32 %v1402_v26, %v1402_v26 }
 0x1e3   :  { %v338_v30 = vadd.f32 %v337_v28, %v1402_v26  ;;  %v344_v31 = vrot.slane %v343_v29, 4  ;;  %v504_v28 = vld [vmem:[%s1636_s8 + $0xe0] sm:$0xff] }
 0x1e5   :  { %v339_v33 = vrot.slane %v338_v30, 2  ;;  %v345_v0 = vadd.f32 %v344_v31, %v343_v29  ;;  %v998_v29 = vpack.c.bf16 %v507_v25, %v503_v23  ;;  %v502_v31 = vld [vmem:[%s1636_s8 + $0xd0] sm:$0xff] }
 0x1e7   :  { %v340_v34 = vadd.f32 %v339_v33, %v338_v30  ;;  %v346_v35 = vrot.slane %v345_v0, 2  ;;  %v968_v30 = vpack.c.bf16 %v504_v28, %v500_v27  ;;  %v1000_v33 = vpack.c.bf16 %v506_v32, %v502_v31  ;;  %v697_v32 = vld [vmem:[%s1637_s6] ss:$0 sm:$0xff] }
 0x1e8   :  { %v459_v31 = vsub.s32 0, %v1408_v36 }
 0x1e9   :  { %v341_v38 = vrot.slane %v340_v34, 1  ;;  %v347_v39 = vadd.f32 %v346_v35, %v345_v0  ;;  %v509_v0 = vld [vmem:[%s1636_s8 + $0x108] sm:$0xff]  ;;  %v511_v35 = vld [vmem:[%s1636_s8 + $0x118] sm:$0xff] }
 0x1eb   :  { %v348_v40 = vrot.slane %v347_v39, 1  ;;  %v342_v41 = vadd.f32 %v341_v38, %v340_v34  ;;  %v513_v34 = vld [vmem:[%s1636_s8 + $0x128] sm:$0xff] }
 0x1ec   :  { %v970_v38 = vpack.c.bf16 %v513_v34, %v509_v0  ;;  %v464_v0 = vsub.s32 1, %v1408_v36 }
 0x1ed   :  { %v349_v42 = vadd.f32 %v348_v40, %v347_v39  ;;  %v515_v39 = vld [vmem:[%s1636_s8 + $0x138] sm:$0xff]  ;;  %v508_v40 = vld [vmem:[%s1636_s8 + $0x100] sm:$0xff] }
 0x1ef   :  { %v353_v43 = vsel %vm352_vm2, %v342_v41, %v349_v42  ;;  %v512_v41 = vld [vmem:[%s1636_s8 + $0x120] sm:$0xff]  ;;  %v1002_v42 = vpack.c.bf16 %v515_v39, %v511_v35 }
 0x1f0   :  { %v354_v44 = vmul.f32 0.125, %v353_v43  ;;  %v972_v43 = vpack.c.bf16 %v512_v41, %v508_v40  ;;  %v698_v40 = vld [vmem:[%s1638_s7] ss:$0 sm:$0xff] }
 0x1f2   :  { %836 = vmatmul.mubr.f32.vlgmr.msra.gmra.mrb[2].mxu1 %v354_v44  ;;  %v510_v44 = vld [vmem:[%s1636_s8 + $0x110] sm:$0xff] }
 0x1f3   :  { %675 = vmatprep.mubr.f32.mxu1 %v1025_v51  ;;  %v476_v51 = vld [vmem:[%s1636_s8] sm:$0xff]  ;;  %989 = vmatpush1.bf16.msra.mxu1 %v988_v58  ;;  %v1004_v46 = vpack.c.bf16 %v514_v45, %v510_v44  ;;  %v518_v58 = vld [vmem:[%s1636_s8 + $0x150] sm:$0xff] }
 0x1f4   :  { %v956_v54 = vpack.c.bf16 %v480_v52, %v476_v51  ;;  %991 = vmatprep.subr.bf16.mxu1 %v990_v3  ;;  %v974_v51 = vpack.c.bf16 %v521_v48, %v517_v47  ;;  %v523_v52 = vld [vmem:[%s1636_s8 + $0x178] sm:$0xff]  ;;  %v1008_v60 = vpack.c.bf16 %v522_v59, %v518_v58  ;;  %v524_v3 = vld [vmem:[%s1636_s8 + $0x180] sm:$0xff] }
 0x1f5   :  { %v1006_v55 = vpack.c.bf16 %v523_v52, %v519_v50 }
 0x1f6   :  { %957 = vmatpush1.bf16.msra.mxu0 %v956_v54  ;;  %v520_v54 = vld [vmem:[%s1636_s8 + $0x160] sm:$0xff] }
 0x1f7   :  { %959 = vmatprep.subr.bf16.mxu0 %v958_v62  ;;  %993 = vmatpush1.bf16.msra.mxu1 %v992_v7  ;;  %v976_v57 = vpack.c.bf16 %v520_v54, %v516_v53  ;;  %v529_v62 = vld [vmem:[%s1636_s8 + $0x1a8] sm:$0xff]  ;;  %v526_v7 = vld [vmem:[%s1636_s8 + $0x190] sm:$0xff] }
 0x1f8   :  { %995 = vmatprep.subr.bf16.mxu1 %v994_v15  ;;  %v978_v1 = vpack.c.bf16 %v529_v62, %v525_v61  ;;  %v1012_v9 = vpack.c.bf16 %v530_v8, %v526_v7  ;;  %v532_v15 = vld [vmem:[%s1636_s8 + $0x1c0] sm:$0xff] }
 0x1fa   :  { %961 = vmatpush1.bf16.msra.mxu0 %v960_v4  ;;  %v528_v4 = vld [vmem:[%s1636_s8 + $0x1a0] sm:$0xff] }
 0x1fb   :  { %963 = vmatprep.subr.bf16.mxu0 %v962_v11  ;;  %997 = vmatpush1.bf16.msra.mxu1 %v996_v20  ;;  %v980_v6 = vpack.c.bf16 %v528_v4, %v524_v3  ;;  %v537_v11 = vld [vmem:[%s1636_s8 + $0x1e8] sm:$0xff]  ;;  %v534_v20 = vld [vmem:[%s1636_s8 + $0x1d0] sm:$0xff] }
 0x1fc   :  { %999 = vmatprep.subr.bf16.mxu1 %v998_v29  ;;  %v982_v13 = vpack.c.bf16 %v537_v11, %v533_v10  ;;  %v1016_v22 = vpack.c.bf16 %v538_v21, %v534_v20 }
 0x1fe   :  { %965 = vmatpush1.bf16.msra.mxu0 %v964_v16  ;;  %v536_v16 = vld [vmem:[%s1636_s8 + $0x1e0] sm:$0xff] }
 0x1ff   :  { %967 = vmatprep.subr.bf16.mxu0 %v966_v24  ;;  %1001 = vmatpush1.bf16.msra.mxu1 %v1000_v33  ;;  %v984_v18 = vpack.c.bf16 %v536_v16, %v532_v15 }
 0x200   :  { %1003 = vmatprep.subr.bf16.mxu1 %v1002_v42 }
 0x202   :  { %969 = vmatpush1.bf16.msra.mxu0 %v968_v30 }
 0x203   :  { %971 = vmatprep.subr.bf16.mxu0 %v970_v38  ;;  %1005 = vmatpush1.bf16.msra.mxu1 %v1004_v46 }
 0x204   :  { %1007 = vmatprep.subr.bf16.mxu1 %v1006_v55 }
 0x206   :  { %973 = vmatpush1.bf16.msra.mxu0 %v972_v43 }
 0x207   :  { %975 = vmatprep.subr.bf16.mxu0 %v974_v51  ;;  %1009 = vmatpush1.bf16.msra.mxu1 %v1008_v60 }
 0x208   :  { %1011 = vmatprep.subr.bf16.mxu1 %v1010_v5 }
 0x20a   :  { %977 = vmatpush1.bf16.msra.mxu0 %v976_v57 }
 0x20b   :  { %979 = vmatprep.subr.bf16.mxu0 %v978_v1  ;;  %1013 = vmatpush1.bf16.msra.mxu1 %v1012_v9 }
 0x20c   :  { %1015 = vmatprep.subr.bf16.mxu1 %v1014_v17 }
 0x20e   :  { %981 = vmatpush1.bf16.msra.mxu0 %v980_v6 }
 0x20f   :  { %983 = vmatprep.subr.bf16.mxu0 %v982_v13  ;;  %1017 = vmatpush1.bf16.msra.mxu1 %v1016_v22 }
 0x212   :  { %985 = vmatpush1.bf16.msra.mxu0 %v984_v18 }
 0x2c5   :  { %v437_v23 = vpop.f32.mrb[2].mxu1 }
 0x2c6   :  { %v441_v24 = vmul.f32 %v437_v23, %v437_v23  ;;  %v837_v25 = vpop.f32.mrb[3].mxu1  ;;  %v460_v33 = vrot.slane %v437_v23, %v459_v31 }
 0x2c8   :  { %v443_v27 = vrot.slane %v441_v24, 7  ;;  %v461_v38 = vsub.f32 %v1402_v26, %v460_v33 }
 0x2ca   :  { %v445_v28 = vsub.f32 %v437_v23, %v443_v27 }
 0x2cc   :  { %v446_v29 = vmax.f32 %v445_v28, 0.0 }
 0x2ce   :  { %v447_v30 = vadd.f32 1e-05, %v446_v29 }
 0x2d0   :  { %1021 = vrsqrt.f32 %v447_v30 }
 0x2da   :  { %v1022_v34 = vpop.eup %1021 }
 0x2db   :  { %v456_v35 = vmul.f32 %v1022_v34, %v697_v32 }
 0x2dd   :  { %v465_v39 = vrot.slane %v456_v35, %v464_v0 }
 0x2df   :  { %v466_v41 = vmul.f32 %v465_v39, %v461_v38 }
 0x2e1   :  { %v474_v42 = vadd.f32 %v698_v40, %v466_v41 }
 0x2e3   :  { %v475_v43 = vmax.f32 %v474_v42, 0.0 }
 0x2e5   :  { %605 = vmatmul.mubr.f32.vlgmr.msra.gmra.mrb[4].mxu0 %v475_v43  ;;  %676 = vmatmul.mubr.f32.vlgmr.msra.gmra.mrb[4].mxu1 %v475_v43 }
 0x3b8   :  { %v606_v44 = vpop.f32.mrb[4].mxu0  ;;  %v677_v45 = vpop.f32.mrb[4].mxu1 }
 0x3b9   :  { %v682_v46 = vadd.f32 %v606_v44, %v1263_v19  ;;  %v684_v36 = vadd.f32 %v677_v45, %v1305_v37  ;;  %v608_v47 = vpop.f32.mrb[5].mxu0  ;;  %v679_v48 = vpop.f32.mrb[5].mxu1 }
 0x3ba   :  { %v683_v26 = vadd.f32 %v608_v47, %v1186_v49  ;;  %v685_v50 = vadd.f32 %v679_v48, %v1201_v56 }
 0x3bb   :  { %686 = vst [vmem:[%s1639_s9] sm:$0xff] %v682_v46  ;;  %688 = vst [vmem:[%s1639_s9 + $0x10] sm:$0xff] %v684_v36 }
 0x3bc   :  { %687 = vst [vmem:[%s1639_s9 + $0x8] sm:$0xff] %v683_v26  ;;  %689 = vst.msk [vmem:[%s1639_s9 + $0x18] sm:$0xff] %vm99_vm0, %v685_v50 }

</bundles_post_ra>
